<compile_context>
chip_gen: v7x
topology: tpu7x:2x2x1
jax: 0.10.0
libtpu: 0.0.40
codegen_flags: <defaults>
</compile_context>

<pallas_src>
import jax
import jax.numpy as jnp
from jax.experimental import pallas as pl
from jax.experimental.pallas import tpu as pltpu


def _round_up(x, m):
    return ((x + m - 1) // m) * m


def _cdiv(a, b):
    return (a + b - 1) // b


def _mlp_kernel(x_ref, w1_ref, b1_ref, w2_ref, b2_ref, w3_ref, b3_ref, o_ref):
    # x tile is f32 (cast to bf16 here; the VPU cast hides under the MXU). Weights are
    # pre-padded bf16, biases pre-padded f32. All dots accumulate in f32 on the MXU;
    # bias add + ReLU stay on the f32 accumulator, downcast only to feed the next dot.
    x = x_ref[...].astype(jnp.bfloat16)
    h1 = jnp.dot(x, w1_ref[...], preferred_element_type=jnp.float32) + b1_ref[...]
    h1 = jnp.maximum(h1, 0.0).astype(jnp.bfloat16)
    h2 = jnp.dot(h1, w2_ref[...], preferred_element_type=jnp.float32) + b2_ref[...]
    h2 = jnp.maximum(h2, 0.0).astype(jnp.bfloat16)
    out = jnp.dot(h2, w3_ref[...], preferred_element_type=jnp.float32) + b3_ref[...]
    o_ref[...] = out.astype(o_ref.dtype)


def prepare_params(params):
    """One-time pad + bf16 cast of the weights (hoisted out of the per-call path).

    params = (w1, b1, w2, b2, w3, b3), weights stored (in_dim, out_dim).
    """
    w1, b1, w2, b2, w3, b3 = params
    S, H = w1.shape
    O = w3.shape[1]
    H_pad = _round_up(H, 128)
    O_pad = _round_up(O, 128)
    # TODO(synk): on v6e/v7x (256x256 MXU) pad H/O to multiples of 256 when real dims
    # are large enough that occupancy gains beat the extra zero FLOPs.

    def pad2(a, rows, cols, dtype):
        a = a.reshape(-1, a.shape[-1]) if a.ndim == 2 else a.reshape(1, -1)
        return jnp.pad(a, ((0, rows - a.shape[0]), (0, cols - a.shape[1]))).astype(dtype)

    return dict(
        dims=(S, H, O, H_pad, O_pad),
        raw=params,  # kept for the small-problem XLA fallback path
        # W1 keeps its real contraction dim S -> no column padding of x is needed.
        w1=pad2(w1, S, H_pad, jnp.bfloat16),
        b1=pad2(b1, 1, H_pad, jnp.float32),
        w2=pad2(w2, H_pad, H_pad, jnp.bfloat16),
        b2=pad2(b2, 1, H_pad, jnp.float32),
        w3=pad2(w3, H_pad, O_pad, jnp.bfloat16),
        b3=pad2(b3, 1, O_pad, jnp.float32),
    )


def observation_model_forward(state, prepared, use_pallas=None):
    """state: (B, state_dim) float32 -> (B, observation_dim) float32."""
    B, S = state.shape
    S_p, H, O, H_pad, O_pad = prepared["dims"]
    assert S == S_p, "state feature dim does not match prepared params"

    if use_pallas is None:
        # Tiny problems: lane padding inflates FLOPs and fixed call overhead dominates;
        # let XLA fuse the plain dot chain instead.
        use_pallas = (B >= 128) or (H >= 256)

    if not use_pallas:
        w1, b1, w2, b2, w3, b3 = prepared["raw"]
        h = jnp.maximum(state @ w1 + b1.reshape(1, -1), 0.0)
        h = jnp.maximum(h @ w2 + b2.reshape(1, -1), 0.0)
        return h @ w3 + b3.reshape(1, -1)

    # --- Batch tiling: multiples of 16 (bf16 sublane packing), balanced so batch
    # padding stays small; up to 512-row tiles (128 MiB VMEM parts).
    # TODO(synk): re-derive MAX_TB against v7x's 64 MiB/TC VMEM at very large H.
    MAX_TB = 512
    n_tiles = _cdiv(B, MAX_TB)
    tb = _round_up(_cdiv(B, n_tiles), 16)
    B_pad = tb * n_tiles
    x = state if B_pad == B else jnp.pad(state, ((0, B_pad - B), (0, 0)))

    # --- VMEM footprint accounting (bytes).
    weight_bytes = 2 * (S * H_pad + H_pad * H_pad + H_pad * O_pad)          # bf16
    bias_bytes = 4 * (2 * H_pad + O_pad)                                     # f32
    single_buffer_weights = 2 * (weight_bytes + bias_bytes) > 16 * 1024 * 1024
    wbuf = 1 if single_buffer_weights else 2
    tile_bytes = 2 * tb * S * 4 + 2 * tb * O_pad * 4                         # x/out, dbl-buf
    interm_bytes = tb * H_pad * (4 + 2) * 2                                  # f32 + bf16 h1/h2
    footprint = wbuf * (weight_bytes + bias_bytes) + tile_bytes + interm_bytes
    vmem_limit = int(min(max(int(footprint * 1.3), 32 * 1024 * 1024), 100 * 1024 * 1024))

    def resident(shape):
        # Constant index_map -> block stays VMEM-resident across all batch tiles.
        if single_buffer_weights:
            return pl.BlockSpec(shape, lambda i: (0, 0), pipeline_mode=pl.Buffered(1))
        return pl.BlockSpec(shape, lambda i: (0, 0))

    flops = 2 * B_pad * (S * H_pad + H_pad * H_pad + H_pad * O_pad)
    bytes_accessed = weight_bytes + bias_bytes + B_pad * S * 4 + B_pad * O_pad * 4

    out_padded = pl.pallas_call(
        _mlp_kernel,
        out_shape=jax.ShapeDtypeStruct((B_pad, O_pad), jnp.float32),
        grid=(n_tiles,),
        in_specs=[
            pl.BlockSpec((tb, S), lambda i: (i, 0)),   # f32 state tile, pipelined
            resident((S, H_pad)), resident((1, H_pad)),
            resident((H_pad, H_pad)), resident((1, H_pad)),
            resident((H_pad, O_pad)), resident((1, O_pad)),
        ],
        out_specs=pl.BlockSpec((tb, O_pad), lambda i: (i, 0)),
        compiler_params=pltpu.CompilerParams(
            dimension_semantics=("parallel",),   # megacore sharding hint
            vmem_limit_bytes=vmem_limit,
        ),
        cost_estimate=pl.CostEstimate(
            flops=flops, transcendentals=0, bytes_accessed=bytes_accessed),
    )(x, prepared["w1"], prepared["b1"], prepared["w2"], prepared["b2"],
      prepared["w3"], prepared["b3"])

    # TODO(synk): on v7x verify both TCs are used (CORE_PARALLEL / core_map) and, when
    # O << 128, benchmark a masked (tb, O) out block / bf16 output vs this padded f32.
    return out_padded[:B, :O]


def init_params(key, state_dim, observation_dim, hidden_dim=None):
    """Deterministic init mirroring nn.Linear's U(-1/sqrt(fan_in), 1/sqrt(fan_in))."""
    hidden_dim = hidden_dim if hidden_dim is not None else state_dim * 2
    dims = [(state_dim, hidden_dim), (hidden_dim, hidden_dim), (hidden_dim, observation_dim)]
    params = []
    for i, (fan_in, fan_out) in enumerate(dims):
        kw, kb = jax.random.split(jax.random.fold_in(key, i))
        bound = 1.0 / jnp.sqrt(fan_in)
        w = jax.random.uniform(kw, (fan_in, fan_out), jnp.float32, -bound, bound)
        b = jax.random.uniform(kb, (1, fan_out), jnp.float32, -bound, bound)
        params += [w, b]
    return tuple(params)


def _reference_forward_bf16(state, params):
    # Mirrors the kernel's numerics: bf16-rounded matmul inputs, f32 accum, f32 bias/ReLU.
    w1, b1, w2, b2, w3, b3 = params
    r = lambda a: a.astype(jnp.bfloat16).astype(jnp.float32)
    h = jnp.maximum(r(state) @ r(w1) + b1, 0.0)
    h = jnp.maximum(r(h) @ r(w2) + b2, 0.0)
    return r(h) @ r(w3) + b3


def _reference_forward_f32(state, params):
    w1, b1, w2, b2, w3, b3 = params
    h = jnp.maximum(state @ w1 + b1, 0.0)
    h = jnp.maximum(h @ w2 + b2, 0.0)
    return h @ w3 + b3


if __name__ == "__main__":
    batch, state_dim, observation_dim = 8, 16, 8   # hidden_dim defaults to 2*state_dim = 32
    key = jax.random.PRNGKey(0)
    k_state, k_params = jax.random.split(key)

    state = jax.random.normal(k_state, (batch, state_dim), jnp.float32)
    params = init_params(k_params, state_dim, observation_dim)
    prepared = prepare_params(params)   # one-time pad + bf16 cast (hoisted out of forward)

    # Force the Pallas kernel path to exercise it (auto-dispatch would route this tiny
    # problem to the fused XLA fallback).
    out = observation_model_forward(state, prepared, use_pallas=True)
    out = jax.block_until_ready(out)
    ref = _reference_forward_bf16(state, params)
    assert out.shape == (batch, observation_dim)
    assert jnp.allclose(out, ref, atol=1e-2, rtol=1e-2), jnp.max(jnp.abs(out - ref))

    # Auto-dispatch: falls back to the plain f32 dot chain at this size.
    out_auto = jax.block_until_ready(observation_model_forward(state, prepared))
    ref32 = _reference_forward_f32(state, params)
    assert jnp.allclose(out_auto, ref32, atol=1e-4, rtol=1e-4)

    print("KERNEL_OK")
</pallas_src>

<mosaic_0001>
module attributes {stable_mosaic.version = 11 : i64} {
  func.func @_mlp_kernel(%arg0: i32, %arg1: memref<16x16xf32, #tpu.memory_space<vmem>>, %arg2: memref<16x128xbf16, #tpu.memory_space<vmem>>, %arg3: memref<1x128xf32, #tpu.memory_space<vmem>>, %arg4: memref<128x128xbf16, #tpu.memory_space<vmem>>, %arg5: memref<1x128xf32, #tpu.memory_space<vmem>>, %arg6: memref<128x128xbf16, #tpu.memory_space<vmem>>, %arg7: memref<1x128xf32, #tpu.memory_space<vmem>>, %arg8: memref<16x128xf32, #tpu.memory_space<vmem>>) attributes {dimension_semantics = [#tpu.dimension_semantics<parallel>], iteration_bounds = array<i64: 1>, scalar_prefetch = 0 : i64, scratch_operands = 0 : i64, tpu.core_type = #tpu.core_type<tc>, window_params = [{transform_indices = @transform_0, window_bounds = array<i64: 16, 16>}, {pipeline_mode = #tpu.pipeline_mode<synchronous>, transform_indices = @transform_1, window_bounds = array<i64: 16, 128>}, {pipeline_mode = #tpu.pipeline_mode<synchronous>, transform_indices = @transform_2, window_bounds = array<i64: 1, 128>}, {pipeline_mode = #tpu.pipeline_mode<synchronous>, transform_indices = @transform_3, window_bounds = array<i64: 128, 128>}, {pipeline_mode = #tpu.pipeline_mode<synchronous>, transform_indices = @transform_4, window_bounds = array<i64: 1, 128>}, {pipeline_mode = #tpu.pipeline_mode<synchronous>, transform_indices = @transform_5, window_bounds = array<i64: 128, 128>}, {pipeline_mode = #tpu.pipeline_mode<synchronous>, transform_indices = @transform_6, window_bounds = array<i64: 1, 128>}, {transform_indices = @transform_7, window_bounds = array<i64: 16, 128>}]} {
    %c0 = arith.constant 0 : index
    %c0_0 = arith.constant 0 : index
    %0 = vector.load %arg1[%c0, %c0_0] : memref<16x16xf32, #tpu.memory_space<vmem>>, vector<16x16xf32>
    %1 = arith.truncf %0 : vector<16x16xf32> to vector<16x16xbf16>
    %c0_1 = arith.constant 0 : index
    %c0_2 = arith.constant 0 : index
    %2 = vector.load %arg2[%c0_1, %c0_2] : memref<16x128xbf16, #tpu.memory_space<vmem>>, vector<16x128xbf16>
    %cst = arith.constant dense<0.000000e+00> : vector<16x128xf32>
    %3 = tpu.matmul %1, %2, %cst {dimension_numbers = #tpu.dot_dimension_numbers<[1], [0], [0], [1], [0, 0, 1, 1], [], []>} : vector<16x16xbf16>, vector<16x128xbf16>, vector<16x128xf32> -> vector<16x128xf32>
    %c0_3 = arith.constant 0 : index
    %c0_4 = arith.constant 0 : index
    %4 = vector.load %arg3[%c0_3, %c0_4] : memref<1x128xf32, #tpu.memory_space<vmem>>, vector<1x128xf32>
    %5 = vector.broadcast %4 : vector<1x128xf32> to vector<16x128xf32>
    %6 = arith.addf %3, %5 : vector<16x128xf32>
    %cst_5 = arith.constant 0.000000e+00 : f32
    %7 = vector.broadcast %cst_5 : f32 to vector<16x128xf32>
    %8 = arith.maximumf %6, %7 : vector<16x128xf32>
    %9 = arith.truncf %8 : vector<16x128xf32> to vector<16x128xbf16>
    %c0_6 = arith.constant 0 : index
    %c0_7 = arith.constant 0 : index
    %10 = vector.load %arg4[%c0_6, %c0_7] : memref<128x128xbf16, #tpu.memory_space<vmem>>, vector<128x128xbf16>
    %cst_8 = arith.constant dense<0.000000e+00> : vector<16x128xf32>
    %11 = tpu.matmul %9, %10, %cst_8 {dimension_numbers = #tpu.dot_dimension_numbers<[1], [0], [0], [1], [0, 0, 1, 1], [], []>} : vector<16x128xbf16>, vector<128x128xbf16>, vector<16x128xf32> -> vector<16x128xf32>
    %c0_9 = arith.constant 0 : index
    %c0_10 = arith.constant 0 : index
    %12 = vector.load %arg5[%c0_9, %c0_10] : memref<1x128xf32, #tpu.memory_space<vmem>>, vector<1x128xf32>
    %13 = vector.broadcast %12 : vector<1x128xf32> to vector<16x128xf32>
    %14 = arith.addf %11, %13 : vector<16x128xf32>
    %cst_11 = arith.constant 0.000000e+00 : f32
    %15 = vector.broadcast %cst_11 : f32 to vector<16x128xf32>
    %16 = arith.maximumf %14, %15 : vector<16x128xf32>
    %17 = arith.truncf %16 : vector<16x128xf32> to vector<16x128xbf16>
    %c0_12 = arith.constant 0 : index
    %c0_13 = arith.constant 0 : index
    %18 = vector.load %arg6[%c0_12, %c0_13] : memref<128x128xbf16, #tpu.memory_space<vmem>>, vector<128x128xbf16>
    %cst_14 = arith.constant dense<0.000000e+00> : vector<16x128xf32>
    %19 = tpu.matmul %17, %18, %cst_14 {dimension_numbers = #tpu.dot_dimension_numbers<[1], [0], [0], [1], [0, 0, 1, 1], [], []>} : vector<16x128xbf16>, vector<128x128xbf16>, vector<16x128xf32> -> vector<16x128xf32>
    %c0_15 = arith.constant 0 : index
    %c0_16 = arith.constant 0 : index
    %20 = vector.load %arg7[%c0_15, %c0_16] : memref<1x128xf32, #tpu.memory_space<vmem>>, vector<1x128xf32>
    %21 = vector.broadcast %20 : vector<1x128xf32> to vector<16x128xf32>
    %22 = arith.addf %19, %21 : vector<16x128xf32>
    %c0_17 = arith.constant 0 : index
    %c0_18 = arith.constant 0 : index
    %23 = vector.load %arg8[%c0_17, %c0_18] : memref<16x128xf32, #tpu.memory_space<vmem>>, vector<16x128xf32>
    tpu.vector_store %arg8[%c0_17, %c0_18], %22 {strides = array<i32>} : memref<16x128xf32, #tpu.memory_space<vmem>>, vector<16x128xf32>,
    return
  }
  func.func @transform_0(%arg0: i32) -> (i32, i32) {
    %c0_i32 = arith.constant 0 : i32
    %c0_i32_0 = arith.constant 0 : i32
    return %arg0, %c0_i32 : i32, i32
  }
  func.func @transform_1(%arg0: i32) -> (i32, i32) {
    %c0_i32 = arith.constant 0 : i32
    %c0_i32_0 = arith.constant 0 : i32
    %c0_i32_1 = arith.constant 0 : i32
    return %c0_i32, %c0_i32_0 : i32, i32
  }
  func.func @transform_2(%arg0: i32) -> (i32, i32) {
    %c0_i32 = arith.constant 0 : i32
    %c0_i32_0 = arith.constant 0 : i32
    %c0_i32_1 = arith.constant 0 : i32
    return %c0_i32, %c0_i32_0 : i32, i32
  }
  func.func @transform_3(%arg0: i32) -> (i32, i32) {
    %c0_i32 = arith.constant 0 : i32
    %c0_i32_0 = arith.constant 0 : i32
    %c0_i32_1 = arith.constant 0 : i32
    return %c0_i32, %c0_i32_0 : i32, i32
  }
  func.func @transform_4(%arg0: i32) -> (i32, i32) {
    %c0_i32 = arith.constant 0 : i32
    %c0_i32_0 = arith.constant 0 : i32
    %c0_i32_1 = arith.constant 0 : i32
    return %c0_i32, %c0_i32_0 : i32, i32
  }
  func.func @transform_5(%arg0: i32) -> (i32, i32) {
    %c0_i32 = arith.constant 0 : i32
    %c0_i32_0 = arith.constant 0 : i32
    %c0_i32_1 = arith.constant 0 : i32
    return %c0_i32, %c0_i32_0 : i32, i32
  }
  func.func @transform_6(%arg0: i32) -> (i32, i32) {
    %c0_i32 = arith.constant 0 : i32
    %c0_i32_0 = arith.constant 0 : i32
    %c0_i32_1 = arith.constant 0 : i32
    return %c0_i32, %c0_i32_0 : i32, i32
  }
  func.func @transform_7(%arg0: i32) -> (i32, i32) {
    %c0_i32 = arith.constant 0 : i32
    %c0_i32_0 = arith.constant 0 : i32
    return %arg0, %c0_i32 : i32, i32
  }
}

</mosaic_0001>

<bundles_post_ra>
// kernel: tpu_custom_call.1
= control target key start
LH: loop header
LB: loop body
LE: loop exit
PB: predicated region body
PF: predicated region fallthrough
CT: control target
= control target key end

     0   :  { %12 = vsyncpa [#allocation3], 0  ;;  %s795_s0 = inlined_call_operand.hbm [shape: f32[16,16], index: 0, kind: input, shape index: {}]   ;;  %s796_s1 = inlined_call_operand.hbm [shape: bf16[16,128], index: 1, kind: input, shape index: {}]   ;;  %s797_s2 = inlined_call_operand.vmem [shape: f32[1,128], index: 2, kind: input, shape index: {}]   ;;  %s798_s3 = inlined_call_operand.hbm [shape: bf16[128,128], index: 3, kind: input, shape index: {}]   ;;  %s799_s4 = inlined_call_operand.vmem [shape: f32[1,128], index: 4, kind: input, shape index: {}]   ;;  %s800_s5 = inlined_call_operand.hbm [shape: bf16[128,128], index: 5, kind: input, shape index: {}]   ;;  %s801_s6 = inlined_call_operand.vmem [shape: f32[1,128], index: 6, kind: input, shape index: {}]   ;;  %s802_s7 = inlined_call_operand.hbm [shape: f32[16,128], index: 7, kind: output, shape index: {}]  }
   0x1   :  { %13 = vsyncpa [#allocation6], 0 }
   0x2   :  { %14 = vsyncpa [#allocation9], 0 }
   0x3   :  { %15 = vsyncpa [#allocation4], 0  ;;  %s630_s24 = smov [#allocation5]   ;;  %s512_s28 = scalar_lea.hbm %s796_s1, 128 }
   0x4   :  { %s33_s25 = sshll.u32 %s630_s24, 4  ;;  %p513_p0 = scmp.ne.s32.totalorder %s796_s1, %s512_s28  ;;  %s34_s25 = int_to_ptr.vmem [resolvable:$true] %s33_s25 }
   0x5   :  { %p516_p1 = scmp.lt.u32.totalorder %s512_s28, %s796_s1 }
   0x7   :  { %p518_p2 = pnand %p516_p1, %p513_p0 }
   0x9   :  { %521 = shalt.err (!%p518_p2)
}
   0xa   :  { %s522_s10 = scalar_lea.vmem %s34_s25, 128  ;;  %p527_p4 = scmp.lt.s32.totalorder %s34_s25, %s34_s25 }
   0xb   :  { %p523_p3 = scmp.ne.s32.totalorder %s34_s25, %s522_s10  ;;  %p528_p5 = scmp.lt.s32.totalorder %s522_s10, %s522_s10 }
   0xd   :  { %p529_p6 = por %p528_p5, %p527_p4 }
   0xf   :  { %p530_p7 = pnand %p529_p6, %p523_p3 }
  0x11   :  { %533 = shalt.err (!%p530_p7)
}
  0x12   :  { %s631_s11 = smov 64   ;;  %s632_s12 = smov 4  }
  0x13   :  { %39 = dma.hbm_to_vmem [thread:$0]  %s796_s1, 128, %s34_s25, [#allocation6], %s631_s11, %s631_s11, %s632_s12  }
  0x14   :  { %s633_s15 = smov [#allocation2]   ;;  %s534_s19 = scalar_lea.hbm %s795_s0, 256 }
  0x15   :  { %s21_s16 = sshll.u32 %s633_s15, 4  ;;  %p535_p8 = scmp.ne.s32.totalorder %s795_s0, %s534_s19  ;;  %s22_s16 = int_to_ptr.vmem [resolvable:$true] %s21_s16 }
  0x16   :  { %p538_p9 = scmp.lt.u32.totalorder %s534_s19, %s795_s0 }
  0x18   :  { %p540_p10 = pnand %p538_p9, %p535_p8 }
  0x1a   :  { %543 = shalt.err (!%p540_p10)
}
  0x1b   :  { %s544_s24 = scalar_lea.vmem %s22_s16, 256  ;;  %p549_p12 = scmp.lt.s32.totalorder %s22_s16, %s22_s16 }
  0x1c   :  { %p545_p11 = scmp.ne.s32.totalorder %s22_s16, %s544_s24  ;;  %p550_p13 = scmp.lt.s32.totalorder %s544_s24, %s544_s24 }
  0x1e   :  { %p551_p0 = por %p550_p13, %p549_p12 }
  0x20   :  { %p552_p1 = pnand %p551_p0, %p545_p11 }
  0x22   :  { %555 = shalt.err (!%p552_p1)
}
  0x23   :  { %s634_s1 = smov 128   ;;  %s635_s25 = smov 8  }
  0x24   :  { %27 = dma.hbm_to_vmem [thread:$0]  %s795_s0, 256, %s22_s16, [#allocation3], %s634_s1, %s634_s1, %s635_s25  }
  0x25   :  { %s636_s28 = smov [#allocation7]   ;;  %s637_s30 = smov [#allocation8]  }
  0x26   :  { %s47_s29 = sshll.u32 %s636_s28, 4  ;;  %s61_s8 = sshll.u32 %s637_s30, 4  ;;  %s48_s29 = int_to_ptr.vmem [resolvable:$true] %s47_s29  ;;  %s711_s8 = int_to_ptr.vmem [resolvable:$true] %s61_s8 }
  0x27   :  { %s556_s13 = scalar_lea.hbm %s798_s3, 1024 }
  0x28   :  { %p557_p2 = scmp.ne.s32.totalorder %s798_s3, %s556_s13  ;;  %p560_p3 = scmp.lt.u32.totalorder %s556_s13, %s798_s3 }
  0x2a   :  { %p562_p4 = pnand %p560_p3, %p557_p2 }
  0x2c   :  { %565 = shalt.err (!%p562_p4)
}
  0x2d   :  { %s566_s0 = scalar_lea.vmem %s48_s29, 1024  ;;  %p571_p6 = scmp.lt.s32.totalorder %s48_s29, %s48_s29 }
  0x2e   :  { %p567_p5 = scmp.ne.s32.totalorder %s48_s29, %s566_s0  ;;  %p572_p7 = scmp.lt.s32.totalorder %s566_s0, %s566_s0 }
  0x30   :  { %p573_p8 = por %p572_p7, %p571_p6 }
  0x32   :  { %p574_p9 = pnand %p573_p8, %p567_p5 }
  0x34   :  { %577 = shalt.err (!%p574_p9)
}
  0x35   :  { %53 = dma.hbm_to_vmem [thread:$0]  %s798_s3, 1024, %s48_s29, [#allocation6], %s631_s11, %s631_s11, %s632_s12  }
  0x36   :  { %s578_s22 = scalar_lea.hbm %s800_s5, 1024 }
  0x37   :  { %p579_p10 = scmp.ne.s32.totalorder %s800_s5, %s578_s22  ;;  %p582_p11 = scmp.lt.u32.totalorder %s578_s22, %s800_s5 }
  0x39   :  { %p584_p12 = pnand %p582_p11, %p579_p10 }
  0x3b   :  { %587 = shalt.err (!%p584_p12)
}
  0x3c   :  { %s588_s28 = scalar_lea.vmem %s711_s8, 1024  ;;  %p593_p0 = scmp.lt.s32.totalorder %s711_s8, %s711_s8 }
  0x3d   :  { %p589_p13 = scmp.ne.s32.totalorder %s711_s8, %s588_s28  ;;  %p594_p1 = scmp.lt.s32.totalorder %s588_s28, %s588_s28 }
  0x3f   :  { %p595_p2 = por %p594_p1, %p593_p0 }
  0x41   :  { %p596_p3 = pnand %p595_p2, %p589_p13 }
  0x43   :  { %599 = shalt.err (!%p596_p3)
}
  0x44   :  { %67 = dma.hbm_to_vmem [thread:$0]  %s800_s5, 1024, %s711_s8, [#allocation9], %s631_s11, %s631_s11, %s632_s12  }
  0x45   :  { %622 = dma.done.wait [#allocation3], 256  }
  0x46   :  { %623 = vsyncadd [#allocation3], 4294967040 }
  0x47   :  { %624 = dma.done.wait [#allocation6], 1152  }
  0x48   :  { %625 = vsyncadd [#allocation6], 4294966144 }
  0x49   :  { %626 = dma.done.wait [#allocation9], 1024  }
  0x4a   :  { %627 = vsyncadd [#allocation9], 4294966272  ;;  %v638_v0 = vmov 0.0   ;;  %vm639_vm0 = vmmov 0   ;;  %v495_v1 = vld [vmem:[#allocation5] sm:$0xff]   ;;  %v83_v2 = vld [vmem:[#allocation2] sm:$0xff] }
  0x4b   :  { %438 = vmatprep.subr.bf16.mxu0 %v638_v0  ;;  %440 = vmatprep.mubr.msk.bf16.mxu0 %vm639_vm0, %v638_v0  ;;  %v84_v3 = vld [vmem:[#allocation2 + $0x8] sm:$0xff]  ;;  %vm101_vm1 = vcmask 130048   ;;  %v496_v5 = vld [vmem:[#allocation7] sm:$0xff]   ;;  %v497_v6 = vld [vmem:[#allocation7 + $0x8] sm:$0xff]   ;;  %s640_s9 = smov [#allocation10]  }
  0x4c   :  { %444 = vmatprep.subr.bf16.mxu1 %v638_v0  ;;  %460 = vmatprep.mubr.msk.bf16.mxu1 %vm639_vm0, %v638_v0  ;;  %v85_v4 = vpack.c.bf16 %v84_v3, %v83_v2  ;;  %v498_v7 = vld [vmem:[#allocation7 + $0x10] sm:$0xff]   ;;  %v499_v8 = vld [vmem:[#allocation7 + $0x18] sm:$0xff]   ;;  %v500_v9 = vld [vmem:[#allocation7 + $0x20] sm:$0xff]   ;;  %s383_s10 = sshll.u32 %s640_s9, 4  ;;  %s384_s10 = int_to_ptr.vmem [resolvable:$true] %s383_s10 }
  0x4d   :  { %439 = vmatpush3.bf16.msra.mxu0 %v495_v1  ;;  %445 = vmatpush3.bf16.msra.mxu1 %v496_v5  ;;  %v501_v10 = vld [vmem:[#allocation7 + $0x28] sm:$0xff]   ;;  %v502_v11 = vld [vmem:[#allocation7 + $0x30] sm:$0xff]   ;;  %v503_v12 = vld [vmem:[#allocation7 + $0x38] sm:$0xff]   ;;  %p605_p5 = scmp.lt.s32.totalorder %s384_s10, %s384_s10 }
  0x4e   :  { %464 = vmatprep.subr.bf16.mxu0 %v638_v0  ;;  %446 = vmatprep.subr.bf16.mxu1 %v638_v0  ;;  %v504_v13 = vld [vmem:[#allocation8] sm:$0xff]   ;;  %v505_v14 = vld [vmem:[#allocation8 + $0x8] sm:$0xff]   ;;  %v506_v15 = vld [vmem:[#allocation8 + $0x10] sm:$0xff]  }
  0x4f   :  { %v507_v16 = vld [vmem:[#allocation8 + $0x18] sm:$0xff]   ;;  %v508_v17 = vld [vmem:[#allocation8 + $0x20] sm:$0xff]   ;;  %v509_v18 = vld [vmem:[#allocation8 + $0x28] sm:$0xff]  }
  0x50   :  { %441 = vmatmul.mubr.msk.bf16.vlgmr.msra.gmra.mrb[0].mxu0 %vm101_vm1, %v85_v4  ;;  %v397_v19 = vld [vmem:[%s797_s2] ss:$0 sm:$0xff]  ;;  %v510_v29 = vld [vmem:[#allocation8 + $0x30] sm:$0xff]   ;;  %v511_v30 = vld [vmem:[#allocation8 + $0x38] sm:$0xff]  }
  0x51   :  { %480 = vmatprep.mubr.msk.bf16.mxu0 %vm639_vm0, %v638_v0  ;;  %447 = vmatpush3.bf16.msra.mxu1 %v497_v6  ;;  %v400_v31 = vld [vmem:[%s799_s4] ss:$0 sm:$0xff]  ;;  %s600_s4 = scalar_lea.vmem %s384_s10, 256 }
  0x52   :  { %448 = vmatprep.subr.bf16.mxu1 %v638_v0  ;;  %465 = vmatpush3.bf16.msra.mxu0 %v504_v13  ;;  %v409_v41 = vld [vmem:[%s801_s6] ss:$0 sm:$0xff]  ;;  %p601_p4 = scmp.ne.s32.totalorder %s384_s10, %s600_s4  ;;  %p606_p6 = scmp.lt.s32.totalorder %s600_s4, %s600_s4 }
  0x53   :  { %466 = vmatprep.subr.bf16.mxu0 %v638_v0 }
  0x54   :  { %p607_p7 = por %p606_p6, %p605_p5 }
  0x55   :  { %449 = vmatpush3.bf16.msra.mxu1 %v498_v7 }
  0x56   :  { %450 = vmatprep.subr.bf16.mxu1 %v638_v0  ;;  %467 = vmatpush3.bf16.msra.mxu0 %v505_v14  ;;  %p608_p8 = pnand %p607_p7, %p601_p4 }
  0x57   :  { %468 = vmatprep.subr.bf16.mxu0 %v638_v0 }
  0x59   :  { %451 = vmatpush3.bf16.msra.mxu1 %v499_v8 }
  0x5a   :  { %452 = vmatprep.subr.bf16.mxu1 %v638_v0  ;;  %469 = vmatpush3.bf16.msra.mxu0 %v506_v15 }
  0x5b   :  { %470 = vmatprep.subr.bf16.mxu0 %v638_v0 }
  0x5d   :  { %453 = vmatpush3.bf16.msra.mxu1 %v500_v9 }
  0x5e   :  { %454 = vmatprep.subr.bf16.mxu1 %v638_v0  ;;  %471 = vmatpush3.bf16.msra.mxu0 %v507_v16 }
  0x5f   :  { %472 = vmatprep.subr.bf16.mxu0 %v638_v0 }
  0x61   :  { %455 = vmatpush3.bf16.msra.mxu1 %v501_v10 }
  0x62   :  { %456 = vmatprep.subr.bf16.mxu1 %v638_v0  ;;  %473 = vmatpush3.bf16.msra.mxu0 %v508_v17 }
  0x63   :  { %474 = vmatprep.subr.bf16.mxu0 %v638_v0 }
  0x65   :  { %457 = vmatpush3.bf16.msra.mxu1 %v502_v11 }
  0x66   :  { %458 = vmatprep.subr.bf16.mxu1 %v638_v0  ;;  %475 = vmatpush3.bf16.msra.mxu0 %v509_v18 }
  0x67   :  { %476 = vmatprep.subr.bf16.mxu0 %v638_v0 }
  0x69   :  { %459 = vmatpush3.bf16.msra.mxu1 %v503_v12 }
  0x6a   :  { %477 = vmatpush3.bf16.msra.mxu0 %v510_v29 }
  0x6b   :  { %478 = vmatprep.subr.bf16.mxu0 %v638_v0 }
  0x6e   :  { %479 = vmatpush3.bf16.msra.mxu0 %v511_v30 }
 0x123   :  { %v139_v20 = vpop.f32.mrb[0].mxu0 }
 0x124   :  { %v140_v21 = vadd.f32 %v397_v19, %v139_v20  ;;  %v442_v22 = vpop.f32.mrb[1].mxu0 }
 0x125   :  { %v142_v23 = vpop.f32.mrb[2].mxu0 }
 0x126   :  { %v143_v24 = vadd.f32 %v397_v19, %v142_v23  ;;  %v443_v25 = vpop.f32.mrb[3].mxu0  ;;  %v146_v26 = vmax.f32 %v140_v21, 0.0 }
 0x128   :  { %v147_v27 = vmax.f32 %v143_v24, 0.0 }
 0x12a   :  { %v148_v28 = vpack.c.bf16 %v147_v27, %v146_v26 }
 0x12c   :  { %461 = vmatmul.mubr.bf16.vlgmr.msra.gmra.mrb[0].mxu1 %v148_v28 }
 0x1ff   :  { %v254_v32 = vpop.f32.mrb[0].mxu1 }
 0x200   :  { %v255_v33 = vadd.f32 %v400_v31, %v254_v32  ;;  %v462_v34 = vpop.f32.mrb[1].mxu1 }
 0x201   :  { %v257_v35 = vpop.f32.mrb[2].mxu1 }
 0x202   :  { %v258_v36 = vadd.f32 %v400_v31, %v257_v35  ;;  %v463_v37 = vpop.f32.mrb[3].mxu1  ;;  %v261_v38 = vmax.f32 %v255_v33, 0.0 }
 0x204   :  { %v262_v39 = vmax.f32 %v258_v36, 0.0 }
 0x206   :  { %v263_v40 = vpack.c.bf16 %v262_v39, %v261_v38 }
 0x208   :  { %481 = vmatmul.mubr.bf16.vlgmr.msra.gmra.mrb[4].mxu0 %v263_v40 }
 0x2db   :  { %v369_v42 = vpop.f32.mrb[4].mxu0 }
 0x2dc   :  { %v370_v43 = vadd.f32 %v409_v41, %v369_v42  ;;  %v482_v44 = vpop.f32.mrb[5].mxu0 }
 0x2dd   :  { %v372_v45 = vpop.f32.mrb[6].mxu0 }
 0x2de   :  { %376 = vst [vmem:[#allocation10] sm:$0xff] %v370_v43  ;;  %v373_v46 = vadd.f32 %v409_v41, %v372_v45  ;;  %v483_v47 = vpop.f32.mrb[7].mxu0 }
 0x2e0   :  { %377 = vst [vmem:[#allocation10 + $0x8] sm:$0xff] %v373_v46 }
 0x2e1   :  { %611 = shalt.err (!%p608_p8)
}
 0x2e2   :  { %s612_s14 = scalar_lea.hbm %s802_s7, 256 }
 0x2e3   :  { %p613_p9 = scmp.ne.s32.totalorder %s802_s7, %s612_s14  ;;  %p616_p10 = scmp.lt.u32.totalorder %s612_s14, %s802_s7 }
 0x2e5   :  { %p618_p11 = pnand %p616_p10, %p613_p9 }
 0x2e7   :  { %621 = shalt.err (!%p618_p11)
}
 0x2e8   :  { %389 = dma.vmem_to_hbm [thread:$0]  %s384_s10, 256, %s802_s7, [#allocation4], %s634_s1, %s634_s1, %s635_s25  }
 0x2e9   :  { %628 = dma.done.wait [#allocation4], 256  }
 0x2ea   :  { %629 = vsyncadd [#allocation4], 4294967040 }
 0x2eb   :  { %393 = vsyncpa [#allocation3], 1 }
 0x2ec   :  { %394 = vsyncpa [#allocation6], 1 }
 0x2ed   :  { %395 = vsyncpa [#allocation9], 1 }
 0x2ee   :  { %396 = vsyncpa [#allocation4], 1 }

</bundles_post_ra>
